<compile_context>
chip_gen: v7x
topology: tpu7x:2x2x1
jax: 0.10.0
libtpu: 0.0.40
codegen_flags: <defaults>
</compile_context>

<pallas_src>
import functools

import jax
import jax.numpy as jnp
from jax.experimental import pallas as pl
from jax.experimental.pallas import tpu as pltpu


def _distmat_kernel(*refs, metric, min_val, max_val):
    """Grid = (N_tiles, M_tiles, K_tiles); K is the contraction (feature) axis."""
    if metric == 'cosine':
        x_ref, y_ref, o_ref = refs
        xsq_ref = ysq_ref = None
    else:
        x_ref, y_ref, xsq_ref, ysq_ref, o_ref = refs

    k = pl.program_id(2)

    @pl.when(k == 0)
    def _():
        o_ref[...] = jnp.zeros_like(o_ref)

    # Hot path: pure MXU accumulation of x @ y.T over the K axis.
    # dot_general contracts axis 1 of both operands -> no explicit transpose.
    o_ref[...] += jax.lax.dot_general(
        x_ref[...], y_ref[...],
        dimension_numbers=(((1,), (1,)), ((), ())),
        preferred_element_type=jnp.float32)

    @pl.when(k == pl.num_programs(2) - 1)
    def _():
        acc = o_ref[...]
        if metric == 'cosine':
            d = acc
        else:  # 'euclidean' or 'sqeuclidean'
            d = xsq_ref[...] + ysq_ref[...] - 2.0 * acc
        d = jnp.clip(d, min_val, max_val)
        if metric == 'euclidean':
            d = jnp.sqrt(d)
        o_ref[...] = d.astype(o_ref.dtype)


def _round_up(a, b):
    return pl.cdiv(a, b) * b


def _pad2(a, rows, cols):
    r, c = a.shape
    if r == rows and c == cols:
        return a  # avoid materializing a padded copy when not needed
    return jnp.pad(a, ((0, rows - r), (0, cols - c)))


def dist_mat(x, y=None, *, metric='euclidean', norm=False,
             min_val=1e-12, max_val=1e12, tm=256, tn=512, tk=512):
    assert metric in ('euclidean', 'sqeuclidean', 'cosine')
    assert x.ndim == 2
    out_dtype = x.dtype

    if norm:
        # F.normalize(p=2, dim=1) equivalent, done in plain JAX.
        x = x / jnp.maximum(jnp.linalg.norm(x, axis=1, keepdims=True), 1e-12)
        if y is not None:
            y = y / jnp.maximum(jnp.linalg.norm(y, axis=1, keepdims=True), 1e-12)

    self_dist = y is None
    if self_dist:
        y = x
    assert x.shape[1] == y.shape[1]

    n, d = x.shape
    m = y.shape[0]

    # Adapt tile sizes down for small problems while keeping (8, 128) legality.
    tm = min(tm, _round_up(n, 8))
    tn = min(tn, _round_up(m, 128))
    tk = min(tk, _round_up(d, 128))

    n_p = _round_up(n, tm)
    m_p = _round_up(m, tn)
    d_p = _round_up(d, tk)

    # Zero padding is safe: padded feature columns contribute 0 to norms and
    # dot products; padded rows only produce output entries we slice away.
    # Inputs keep their native dtype (bf16 inputs feed the MXU directly).
    x_p = _pad2(x, n_p, d_p)
    y_p = x_p if (self_dist and m_p == n_p) else _pad2(y, m_p, d_p)

    inputs = [x_p, y_p]
    in_specs = [
        pl.BlockSpec((tm, tk), lambda i, j, k: (i, k)),
        pl.BlockSpec((tn, tk), lambda i, j, k: (j, k)),
    ]

    if metric.endswith('euclidean'):
        # Hoist row squared norms out of the kernel: a single mem-bound pass
        # each (reused for both operands in the self-distance case), always
        # accumulated in f32.  Block index is K-invariant -> DMA'd once per
        # output tile, so the hot K loop stays pure MXU.
        xsq = jnp.sum(jnp.square(x.astype(jnp.float32)), axis=1, keepdims=True)  # (n, 1)
        ysq = xsq if self_dist else jnp.sum(
            jnp.square(y.astype(jnp.float32)), axis=1, keepdims=True)            # (m, 1)
        xsq_p = _pad2(xsq, n_p, 1)          # (n_p, 1)
        ysq_p = _pad2(ysq, m_p, 1).T        # (1, m_p)
        inputs += [xsq_p, ysq_p]
        in_specs += [
            pl.BlockSpec((tm, 1), lambda i, j, k: (i, 0)),
            pl.BlockSpec((1, tn), lambda i, j, k: (0, j)),
        ]

    kernel = functools.partial(_distmat_kernel, metric=metric,
                               min_val=float(min_val), max_val=float(max_val))

    out_p = pl.pallas_call(
        kernel,
        out_shape=jax.ShapeDtypeStruct((n_p, m_p), jnp.float32),
        grid_spec=pltpu.PrefetchScalarGridSpec(
            num_scalar_prefetch=0,
            grid=(n_p // tm, m_p // tn, d_p // tk),
            in_specs=in_specs,
            out_specs=pl.BlockSpec((tm, tn), lambda i, j, k: (i, j)),
        ),
        compiler_params=pltpu.CompilerParams(
            dimension_semantics=("parallel", "parallel", "arbitrary")),
    )(*inputs)

    out = out_p if (n_p == n and m_p == m) else out_p[:n, :m]
    return out.astype(out_dtype)


def _ref_distmat(x, y=None, metric='euclidean', norm=False,
                 min_val=1e-12, max_val=1e12):
    if norm:
        x = x / jnp.maximum(jnp.linalg.norm(x, axis=1, keepdims=True), 1e-12)
        if y is not None:
            y = y / jnp.maximum(jnp.linalg.norm(y, axis=1, keepdims=True), 1e-12)
    if y is None:
        y = x
    prod = jnp.dot(x, y.T, precision=jax.lax.Precision.HIGHEST)
    if metric == 'cosine':
        d = prod
    else:
        d = (jnp.sum(x * x, axis=1, keepdims=True)
             + jnp.sum(y * y, axis=1, keepdims=True).T
             - 2.0 * prod)
    d = jnp.clip(d, min_val, max_val)
    if metric == 'euclidean':
        d = jnp.sqrt(d)
    return d


if __name__ == "__main__":
    key = jax.random.PRNGKey(0)
    kx, ky = jax.random.split(key)

    # Small shapes consistent with the module: (batch, feat_dim).
    n, m, d = 48, 24, 256
    x = jax.random.normal(kx, (n, d), dtype=jnp.float32)
    y = jax.random.normal(ky, (m, d), dtype=jnp.float32)

    # Default (large, MXU-aligned, auto-shrunk) tiles; self-distance case.
    d_self = dist_mat(x)                                     # (48, 48)
    # Small explicit tiles to exercise a multi-step grid (3, 1, 2) and the
    # K-axis accumulation / epilogue path.
    d_xy = dist_mat(x, y, tm=16, tn=128, tk=128)             # (48, 24)
    d_sq = dist_mat(x, y, metric='sqeuclidean')              # (48, 24)
    d_cos = dist_mat(x, y, metric='cosine', norm=True)       # (48, 24)
    jax.block_until_ready((d_self, d_xy, d_sq, d_cos))

    ref_self = _ref_distmat(x)
    ref_xy = _ref_distmat(x, y)
    ref_sq = _ref_distmat(x, y, metric='sqeuclidean')
    ref_cos = _ref_distmat(x, y, metric='cosine', norm=True)

    assert d_self.shape == (n, n)
    assert d_xy.shape == (n, m) and d_sq.shape == (n, m) and d_cos.shape == (n, m)

    def close(a, b, rtol=3e-2, atol=3e-2):
        return bool(jnp.allclose(a, b, rtol=rtol, atol=atol))

    # The diagonal of a euclidean self-distance matrix is sqrt(clamp(a
    # catastrophically-cancelled ~0 value, 1e-12)); it is not numerically
    # comparable between two different f32 evaluation orders, so compare
    # off-diagonal entries tightly and only sanity-bound the diagonal.
    offdiag = ~jnp.eye(n, dtype=bool)
    assert close(jnp.where(offdiag, d_self, 0.0), jnp.where(offdiag, ref_self, 0.0))
    assert bool(jnp.all(jnp.diag(d_self) < 2.0))  # off-diagonal ~ sqrt(2*d) ~ 22

    assert close(d_xy, ref_xy)
    assert close(d_sq, ref_sq)
    assert close(d_cos, ref_cos)

    print("KERNEL_OK")
</pallas_src>

<mosaic_0001>
module attributes {stable_mosaic.version = 11 : i64} {
  func.func @_distmat_kernel(%arg0: i32, %arg1: i32, %arg2: i32, %arg3: memref<48x256xf32, #tpu.memory_space<vmem>>, %arg4: memref<128x256xf32, #tpu.memory_space<vmem>>, %arg5: memref<48x1xf32, #tpu.memory_space<vmem>>, %arg6: memref<1x128xf32, #tpu.memory_space<vmem>>, %arg7: memref<48x128xf32, #tpu.memory_space<vmem>>) attributes {dimension_semantics = [#tpu.dimension_semantics<parallel>, #tpu.dimension_semantics<parallel>, #tpu.dimension_semantics<arbitrary>], iteration_bounds = array<i64: 1, 1, 1>, scalar_prefetch = 0 : i64, scratch_operands = 0 : i64, tpu.core_type = #tpu.core_type<tc>, window_params = [{transform_indices = @transform_0, window_bounds = array<i64: 48, 256>}, {transform_indices = @transform_1, window_bounds = array<i64: 128, 256>}, {transform_indices = @transform_2, window_bounds = array<i64: 48, 1>}, {transform_indices = @transform_3, window_bounds = array<i64: 1, 128>}, {transform_indices = @transform_4, window_bounds = array<i64: 48, 128>}]} {
    %c0_i32 = arith.constant 0 : i32
    %0 = arith.cmpi eq, %arg2, %c0_i32 : i32
    %1 = arith.extui %0 : i1 to i32
    %c0_i32_0 = arith.constant 0 : i32
    %2 = arith.cmpi ne, %1, %c0_i32_0 : i32
    scf.if %2 {
      %cst_10 = arith.constant 0.000000e+00 : f32
      %12 = vector.broadcast %cst_10 : f32 to vector<48x128xf32>
      %c0_11 = arith.constant 0 : index
      %c0_12 = arith.constant 0 : index
      %13 = vector.load %arg7[%c0_11, %c0_12] : memref<48x128xf32, #tpu.memory_space<vmem>>, vector<48x128xf32>
      tpu.vector_store %arg7[%c0_11, %c0_12], %12 {strides = array<i32>} : memref<48x128xf32, #tpu.memory_space<vmem>>, vector<48x128xf32>,
    } else {
    }
    %c0 = arith.constant 0 : index
    %c0_1 = arith.constant 0 : index
    %3 = vector.load %arg7[%c0, %c0_1] : memref<48x128xf32, #tpu.memory_space<vmem>>, vector<48x128xf32>
    %c0_2 = arith.constant 0 : index
    %c0_3 = arith.constant 0 : index
    %4 = vector.load %arg3[%c0_2, %c0_3] : memref<48x256xf32, #tpu.memory_space<vmem>>, vector<48x256xf32>
    %c0_4 = arith.constant 0 : index
    %c0_5 = arith.constant 0 : index
    %5 = vector.load %arg4[%c0_4, %c0_5] : memref<128x256xf32, #tpu.memory_space<vmem>>, vector<128x256xf32>
    %cst = arith.constant dense<0.000000e+00> : vector<48x128xf32>
    %6 = tpu.matmul %4, %5, %cst {dimension_numbers = #tpu.dot_dimension_numbers<[1], [1], [0], [0], [0, 0, 1, 0], [], []>} : vector<48x256xf32>, vector<128x256xf32>, vector<48x128xf32> -> vector<48x128xf32>
    %7 = arith.addf %3, %6 : vector<48x128xf32>
    %c0_6 = arith.constant 0 : index
    %c0_7 = arith.constant 0 : index
    %8 = vector.load %arg7[%c0_6, %c0_7] : memref<48x128xf32, #tpu.memory_space<vmem>>, vector<48x128xf32>
    tpu.vector_store %arg7[%c0_6, %c0_7], %7 {strides = array<i32>} : memref<48x128xf32, #tpu.memory_space<vmem>>, vector<48x128xf32>,
    %c0_i32_8 = arith.constant 0 : i32
    %9 = arith.cmpi eq, %arg2, %c0_i32_8 : i32
    %10 = arith.extui %9 : i1 to i32
    %c0_i32_9 = arith.constant 0 : i32
    %11 = arith.cmpi ne, %10, %c0_i32_9 : i32
    scf.if %11 {
      %c0_10 = arith.constant 0 : index
      %c0_11 = arith.constant 0 : index
      %12 = vector.load %arg7[%c0_10, %c0_11] : memref<48x128xf32, #tpu.memory_space<vmem>>, vector<48x128xf32>
      %c0_12 = arith.constant 0 : index
      %c0_13 = arith.constant 0 : index
      %13 = vector.load %arg5[%c0_12, %c0_13] : memref<48x1xf32, #tpu.memory_space<vmem>>, vector<48x1xf32>
      %c0_14 = arith.constant 0 : index
      %c0_15 = arith.constant 0 : index
      %14 = vector.load %arg6[%c0_14, %c0_15] : memref<1x128xf32, #tpu.memory_space<vmem>>, vector<1x128xf32>
      %15 = vector.broadcast %13 : vector<48x1xf32> to vector<48x128xf32>
      %16 = vector.broadcast %14 : vector<1x128xf32> to vector<48x128xf32>
      %17 = arith.addf %15, %16 : vector<48x128xf32>
      %cst_16 = arith.constant 2.000000e+00 : f32
      %18 = vector.broadcast %cst_16 : f32 to vector<48x128xf32>
      %19 = arith.mulf %18, %12 : vector<48x128xf32>
      %20 = arith.subf %17, %19 : vector<48x128xf32>
      %cst_17 = arith.constant 9.99999996E-13 : f32
      %cst_18 = arith.constant 9.99999995E+11 : f32
      %21 = vector.broadcast %cst_17 : f32 to vector<48x128xf32>
      %22 = arith.maximumf %21, %20 : vector<48x128xf32>
      %23 = vector.broadcast %cst_18 : f32 to vector<48x128xf32>
      %24 = arith.minimumf %23, %22 : vector<48x128xf32>
      %25 = math.sqrt %24 : vector<48x128xf32>
      %c0_19 = arith.constant 0 : index
      %c0_20 = arith.constant 0 : index
      %26 = vector.load %arg7[%c0_19, %c0_20] : memref<48x128xf32, #tpu.memory_space<vmem>>, vector<48x128xf32>
      tpu.vector_store %arg7[%c0_19, %c0_20], %25 {strides = array<i32>} : memref<48x128xf32, #tpu.memory_space<vmem>>, vector<48x128xf32>,
    } else {
    }
    return
  }
  func.func @transform_0(%arg0: i32, %arg1: i32, %arg2: i32) -> (i32, i32) {
    %c0_i32 = arith.constant 0 : i32
    return %arg0, %arg2 : i32, i32
  }
  func.func @transform_1(%arg0: i32, %arg1: i32, %arg2: i32) -> (i32, i32) {
    %c0_i32 = arith.constant 0 : i32
    return %arg1, %arg2 : i32, i32
  }
  func.func @transform_2(%arg0: i32, %arg1: i32, %arg2: i32) -> (i32, i32) {
    %c0_i32 = arith.constant 0 : i32
    %c0_i32_0 = arith.constant 0 : i32
    return %arg0, %c0_i32 : i32, i32
  }
  func.func @transform_3(%arg0: i32, %arg1: i32, %arg2: i32) -> (i32, i32) {
    %c0_i32 = arith.constant 0 : i32
    %c0_i32_0 = arith.constant 0 : i32
    return %c0_i32, %arg1 : i32, i32
  }
  func.func @transform_4(%arg0: i32, %arg1: i32, %arg2: i32) -> (i32, i32) {
    %c0_i32 = arith.constant 0 : i32
    return %arg0, %arg1 : i32, i32
  }
}

</mosaic_0001>

<bundles_post_ra>
// kernel: tpu_custom_call.1
= control target key start
LH: loop header
LB: loop body
LE: loop exit
PB: predicated region body
PF: predicated region fallthrough
CT: control target
= control target key end

     0   :  { %9 = vsyncpa [#allocation3], 0  ;;  %s595_s0 = inlined_call_operand.hbm [shape: f32[48,256], index: 0, kind: input, shape index: {}]   ;;  %s596_s1 = inlined_call_operand.hbm [shape: f32[128,256], index: 1, kind: input, shape index: {}]   ;;  %s597_s2 = inlined_call_operand.vmem [shape: f32[48,1], index: 2, kind: input, shape index: {}]   ;;  %s598_s3 = inlined_call_operand.vmem [shape: f32[1,128], index: 3, kind: input, shape index: {}]   ;;  %s599_s4 = inlined_call_operand.hbm [shape: f32[48,128], index: 4, kind: output, shape index: {}]  }
   0x1   :  { %10 = vsyncpa [#allocation6], 0 }
   0x2   :  { %11 = vsyncpa [#allocation4], 0  ;;  %s505_s15 = smov [#allocation2]   ;;  %s433_s19 = scalar_lea.hbm %s595_s0, 1536 }
   0x3   :  { %s17_s16 = sshll.u32 %s505_s15, 4  ;;  %p434_p0 = scmp.ne.s32.totalorder %s595_s0, %s433_s19  ;;  %s18_s16 = int_to_ptr.vmem [resolvable:$true] %s17_s16 }
   0x4   :  { %p437_p1 = scmp.lt.u32.totalorder %s433_s19, %s595_s0 }
   0x6   :  { %p439_p2 = pnand %p437_p1, %p434_p0 }
   0x8   :  { %442 = shalt.err (!%p439_p2)
}
   0x9   :  { %s443_s24 = scalar_lea.vmem %s18_s16, 1536  ;;  %p448_p4 = scmp.lt.s32.totalorder %s18_s16, %s18_s16 }
   0xa   :  { %p444_p3 = scmp.ne.s32.totalorder %s18_s16, %s443_s24  ;;  %p449_p5 = scmp.lt.s32.totalorder %s443_s24, %s443_s24 }
   0xc   :  { %p450_p6 = por %p449_p5, %p448_p4 }
   0xe   :  { %p451_p7 = pnand %p450_p6, %p444_p3 }
  0x10   :  { %454 = shalt.err (!%p451_p7)
}
  0x11   :  { %s506_s25 = smov 256   ;;  %s507_s26 = smov 16  }
  0x12   :  { %23 = dma.hbm_to_vmem [thread:$0]  %s595_s0, 1536, %s18_s16, [#allocation3], %s506_s25, %s506_s25, %s507_s26  }
  0x13   :  { %s508_s29 = smov [#allocation5]   ;;  %s455_s7 = scalar_lea.hbm %s596_s1, 4096 }
  0x14   :  { %s29_s30 = sshll.u32 %s508_s29, 4  ;;  %p456_p8 = scmp.ne.s32.totalorder %s596_s1, %s455_s7  ;;  %s30_s30 = int_to_ptr.vmem [resolvable:$true] %s29_s30 }
  0x15   :  { %p459_p9 = scmp.lt.u32.totalorder %s455_s7, %s596_s1 }
  0x17   :  { %p461_p10 = pnand %p459_p9, %p456_p8 }
  0x19   :  { %464 = shalt.err (!%p461_p10)
}
  0x1a   :  { %s465_s12 = scalar_lea.vmem %s30_s30, 4096  ;;  %p470_p12 = scmp.lt.s32.totalorder %s30_s30, %s30_s30 }
  0x1b   :  { %p466_p11 = scmp.ne.s32.totalorder %s30_s30, %s465_s12  ;;  %p471_p13 = scmp.lt.s32.totalorder %s465_s12, %s465_s12 }
  0x1d   :  { %p472_p0 = por %p471_p13, %p470_p12 }
  0x1f   :  { %p473_p1 = pnand %p472_p0, %p466_p11 }
  0x21   :  { %476 = shalt.err (!%p473_p1)
}
  0x22   :  { %35 = dma.hbm_to_vmem [thread:$0]  %s596_s1, 4096, %s30_s30, [#allocation6], %s506_s25, %s506_s25, %s507_s26  }
  0x23   :  { %499 = dma.done.wait [#allocation3], 1536  }
  0x24   :  { %500 = vsyncadd [#allocation3], 4294965760 }
  0x25   :  { %501 = dma.done.wait [#allocation6], 4096  }
  0x26   :  { %502 = vsyncadd [#allocation6], 4294963200  ;;  %v509_v0 = vmov 0   ;;  %v75_v1 = vld [vmem:[#allocation5 + $0x8] sm:$0xff]  ;;  %v77_v2 = vld [vmem:[#allocation5 + $0x18] sm:$0xff] }
  0x27   :  { %420 = vset.pattern.permute.xlu1 %v509_v0  ;;  %419 = vset.pattern.permute.xlu0 %v509_v0  ;;  %v74_v3 = vld [vmem:[#allocation5] sm:$0xff]  ;;  %v362_v4 = vpack.c.bf16 %v77_v2, %v75_v1  ;;  %v76_v5 = vld [vmem:[#allocation5 + $0x10] sm:$0xff]  ;;  %v79_v6 = vld [vmem:[#allocation5 + $0x28] sm:$0xff] }
  0x28   :  { %v81_v7 = vld [vmem:[#allocation5 + $0x38] sm:$0xff]  ;;  %v364_v8 = vpack.c.bf16 %v76_v5, %v74_v3  ;;  %v78_v10 = vld [vmem:[#allocation5 + $0x20] sm:$0xff]  ;;  %v80_v11 = vld [vmem:[#allocation5 + $0x30] sm:$0xff] }
  0x29   :  { %v366_v9 = vpack.c.bf16 %v81_v7, %v79_v6  ;;  %363 = vmatprep.subr.bf16.mxu0 %v362_v4  ;;  %394 = vmatprep.subr.bf16.mxu1 %v362_v4  ;;  %v83_v12 = vld [vmem:[#allocation5 + $0x48] sm:$0xff]  ;;  %v85_v13 = vld [vmem:[#allocation5 + $0x58] sm:$0xff]  ;;  %v368_v14 = vpack.c.bf16 %v80_v11, %v78_v10  ;;  %v82_v18 = vld [vmem:[#allocation5 + $0x40] sm:$0xff] }
  0x2a   :  { %365 = vmatpush1.bf16.xpose.msra.mxu0 %v364_v8  ;;  %402 = vmatpush1.bf16.xpose.msra.mxu1 %v364_v8  ;;  %v370_v15 = vpack.c.bf16 %v85_v13, %v83_v12  ;;  %v63_v16 = vld [vmem:[#allocation2 + $0x8] sm:$0xff]  ;;  %v69_v17 = vld [vmem:[#allocation2 + $0x38] sm:$0xff]  ;;  %v84_v19 = vld [vmem:[#allocation5 + $0x50] sm:$0xff] }
  0x2b   :  { %367 = vmatprep.subr.bf16.mxu0 %v366_v9  ;;  %395 = vmatprep.subr.bf16.mxu1 %v366_v9  ;;  %v87_v20 = vld [vmem:[#allocation5 + $0x68] sm:$0xff]  ;;  %v89_v21 = vld [vmem:[#allocation5 + $0x78] sm:$0xff]  ;;  %v224_v22 = vld [vmem:[%s597_s2 + $0x10] sm:$0xff]  ;;  %v372_v24 = vpack.c.bf16 %v84_v19, %v82_v18 }
  0x2c   :  { %170 = vmatprep.mubr.f32.mxu0 %v63_v16  ;;  %185 = vmatprep.mubr.f32.mxu1 %v69_v17  ;;  %v222_v23 = vld [vmem:[%s597_s2] sm:$0xff]  ;;  %v225_v25 = vld [vmem:[%s597_s2 + $0x18] sm:$0xff]  ;;  %v374_v26 = vpack.c.bf16 %v89_v21, %v87_v20  ;;  %v223_v27 = vld [vmem:[%s597_s2 + $0x8] sm:$0xff] }
  0x2d   :  { %241 = vperm.xlu1 %420, %v224_v22   ;;  %231 = vperm.xlu0 %419, %v222_v23   ;;  %v227_v28 = vld [vmem:[%s597_s2 + $0x28] sm:$0xff]  ;;  %v86_v29 = vld [vmem:[#allocation5 + $0x60] sm:$0xff]  ;;  %v88_v30 = vld [vmem:[#allocation5 + $0x70] sm:$0xff] }
  0x2e   :  { %v91_v31 = vld [vmem:[#allocation5 + $0x88] sm:$0xff]  ;;  %v93_v32 = vld [vmem:[#allocation5 + $0x98] sm:$0xff]  ;;  %v226_v33 = vld [vmem:[%s597_s2 + $0x20] sm:$0xff]  ;;  %v376_v34 = vpack.c.bf16 %v88_v30, %v86_v29 }
  0x2f   :  { %v378_v35 = vpack.c.bf16 %v93_v32, %v91_v31  ;;  %v90_v36 = vld [vmem:[#allocation5 + $0x80] sm:$0xff]  ;;  %v92_v37 = vld [vmem:[#allocation5 + $0x90] sm:$0xff]  ;;  %v95_v38 = vld [vmem:[#allocation5 + $0xa8] sm:$0xff] }
  0x30   :  { %v97_v39 = vld [vmem:[#allocation5 + $0xb8] sm:$0xff]  ;;  %v380_v40 = vpack.c.bf16 %v92_v37, %v90_v36  ;;  %v94_v42 = vld [vmem:[#allocation5 + $0xa0] sm:$0xff]  ;;  %v96_v43 = vld [vmem:[#allocation5 + $0xb0] sm:$0xff] }
  0x31   :  { %246 = vperm.xlu1 %420, %v225_v25   ;;  %236 = vperm.xlu0 %419, %v223_v27   ;;  %v382_v41 = vpack.c.bf16 %v97_v39, %v95_v38  ;;  %v99_v44 = vld [vmem:[#allocation5 + $0xc8] sm:$0xff]  ;;  %v101_v45 = vld [vmem:[#allocation5 + $0xd8] sm:$0xff]  ;;  %v384_v46 = vpack.c.bf16 %v96_v43, %v94_v42  ;;  %v98_v48 = vld [vmem:[#allocation5 + $0xc0] sm:$0xff] }
  0x32   :  { %369 = vmatpush1.bf16.xpose.msra.mxu0 %v368_v14  ;;  %403 = vmatpush1.bf16.xpose.msra.mxu1 %v368_v14  ;;  %v386_v47 = vpack.c.bf16 %v101_v45, %v99_v44  ;;  %v100_v49 = vld [vmem:[#allocation5 + $0xd0] sm:$0xff]  ;;  %v103_v50 = vld [vmem:[#allocation5 + $0xe8] sm:$0xff]  ;;  %v105_v51 = vld [vmem:[#allocation5 + $0xf8] sm:$0xff] }
  0x33   :  { %371 = vmatprep.subr.bf16.mxu0 %v370_v15  ;;  %396 = vmatprep.subr.bf16.mxu1 %v370_v15  ;;  %v388_v52 = vpack.c.bf16 %v100_v49, %v98_v48  ;;  %v390_v53 = vpack.c.bf16 %v105_v51, %v103_v50  ;;  %v102_v54 = vld [vmem:[#allocation5 + $0xe0] sm:$0xff]  ;;  %v104_v55 = vld [vmem:[#allocation5 + $0xf0] sm:$0xff]  ;;  %v65_v59 = vld [vmem:[#allocation2 + $0x18] sm:$0xff] }
  0x34   :  { %v392_v56 = vpack.c.bf16 %v104_v55, %v102_v54  ;;  %v62_v57 = vld [vmem:[#allocation2] sm:$0xff]  ;;  %v68_v58 = vld [vmem:[#allocation2 + $0x30] sm:$0xff]  ;;  %v71_v60 = vld [vmem:[#allocation2 + $0x48] sm:$0xff] }
  0x35   :  { %256 = vperm.xlu1 %420, %v227_v28   ;;  %251 = vperm.xlu0 %419, %v226_v33   ;;  %v64_v61 = vld [vmem:[#allocation2 + $0x10] sm:$0xff]  ;;  %v70_v62 = vld [vmem:[#allocation2 + $0x40] sm:$0xff]  ;;  %v67_v63 = vld [vmem:[#allocation2 + $0x28] sm:$0xff] }
  0x36   :  { %v73_v0 = vld [vmem:[#allocation2 + $0x58] sm:$0xff]  ;;  %v66_v1 = vld [vmem:[#allocation2 + $0x20] sm:$0xff]  ;;  %v72_v2 = vld [vmem:[#allocation2 + $0x50] sm:$0xff] }
  0x37   :  { %v361_v6 = vld [vmem:[%s598_s3] ss:$0 sm:$0xff]  ;;  %s510_s3 = smov [#allocation7]  }
  0x38   :  { %s348_s26 = sshll.u32 %s510_s3, 4  ;;  %s349_s26 = int_to_ptr.vmem [resolvable:$true] %s348_s26 }
  0x39   :  { %s477_s27 = scalar_lea.vmem %s349_s26, 768  ;;  %p482_p3 = scmp.lt.s32.totalorder %s349_s26, %s349_s26 }
  0x3a   :  { %373 = vmatpush1.bf16.xpose.msra.mxu0 %v372_v24  ;;  %404 = vmatpush1.bf16.xpose.msra.mxu1 %v372_v24  ;;  %p478_p2 = scmp.ne.s32.totalorder %s349_s26, %s477_s27  ;;  %p483_p4 = scmp.lt.s32.totalorder %s477_s27, %s477_s27 }
  0x3b   :  { %375 = vmatprep.subr.bf16.mxu0 %v374_v26  ;;  %397 = vmatprep.subr.bf16.mxu1 %v374_v26 }
  0x3c   :  { %p484_p5 = por %p483_p4, %p482_p3 }
  0x3e   :  { %p485_p6 = pnand %p484_p5, %p478_p2 }
  0x42   :  { %377 = vmatpush1.bf16.xpose.msra.mxu0 %v376_v34  ;;  %405 = vmatpush1.bf16.xpose.msra.mxu1 %v376_v34 }
  0x43   :  { %379 = vmatprep.subr.bf16.mxu0 %v378_v35  ;;  %398 = vmatprep.subr.bf16.mxu1 %v378_v35 }
  0x4a   :  { %381 = vmatpush1.bf16.xpose.msra.mxu0 %v380_v40  ;;  %406 = vmatpush1.bf16.xpose.msra.mxu1 %v380_v40 }
  0x4b   :  { %383 = vmatprep.subr.bf16.mxu0 %v382_v41  ;;  %399 = vmatprep.subr.bf16.mxu1 %v382_v41 }
  0x52   :  { %385 = vmatpush1.bf16.xpose.msra.mxu0 %v384_v46  ;;  %407 = vmatpush1.bf16.xpose.msra.mxu1 %v384_v46 }
  0x53   :  { %387 = vmatprep.subr.bf16.mxu0 %v386_v47  ;;  %400 = vmatprep.subr.bf16.mxu1 %v386_v47 }
  0x5a   :  { %389 = vmatpush1.bf16.xpose.msra.mxu0 %v388_v52  ;;  %408 = vmatpush1.bf16.xpose.msra.mxu1 %v388_v52 }
  0x5b   :  { %391 = vmatprep.subr.bf16.mxu0 %v390_v53  ;;  %401 = vmatprep.subr.bf16.mxu1 %v390_v53 }
  0x62   :  { %393 = vmatpush1.bf16.xpose.msra.mxu0 %v392_v56  ;;  %409 = vmatpush1.bf16.xpose.msra.mxu1 %v392_v56 }
  0x69   :  { %171 = vmatmul.mubr.f32.vlgmr.msra.gmra.mrb[0].mxu0 %v62_v57  ;;  %186 = vmatmul.mubr.f32.vlgmr.msra.gmra.mrb[0].mxu1 %v68_v58 }
  0x6a   :  { %175 = vmatprep.mubr.f32.mxu0 %v65_v59  ;;  %190 = vmatprep.mubr.f32.mxu1 %v71_v60 }
  0x6d   :  { %176 = vmatmul.mubr.f32.gmra.mrb[2].mxu0 %v64_v61  ;;  %191 = vmatmul.mubr.f32.gmra.mrb[2].mxu1 %v70_v62 }
  0x6e   :  { %180 = vmatprep.mubr.f32.mxu0 %v67_v63  ;;  %195 = vmatprep.mubr.f32.mxu1 %v73_v0 }
  0x71   :  { %181 = vmatmul.mubr.f32.gmra.mrb[4].mxu0 %v66_v1  ;;  %196 = vmatmul.mubr.f32.gmra.mrb[4].mxu1 %v72_v2 }
  0xac   :  { %v232_v3 = vpop.permute.xlu0 %231  ;;  %v242_v4 = vpop.permute.xlu1 %241 }
  0xad   :  { %v265_v12 = vadd.f32 %v361_v6, %v232_v3  ;;  %v267_v38 = vadd.f32 %v361_v6, %v242_v4 }
  0xb0   :  { %v237_v5 = vpop.permute.xlu0 %236  ;;  %v247_v7 = vpop.permute.xlu1 %246 }
  0xb1   :  { %v268_v13 = vadd.f32 %v361_v6, %v247_v7  ;;  %v266_v23 = vadd.f32 %v361_v6, %v237_v5 }
  0xb4   :  { %v252_v16 = vpop.permute.xlu0 %251  ;;  %v257_v27 = vpop.permute.xlu1 %256 }
  0xb5   :  { %v269_v31 = vadd.f32 %v361_v6, %v252_v16  ;;  %v270_v39 = vadd.f32 %v361_v6, %v257_v27 }
 0x13c   :  { %v172_v8 = vpop.f32.mrb[0].mxu0  ;;  %v187_v9 = vpop.f32.mrb[0].mxu1 }
 0x13d   :  { %v174_v10 = vpop.f32.mrb[1].mxu0  ;;  %v189_v11 = vpop.f32.mrb[1].mxu1  ;;  %v271_v14 = vmul.f32 2.0, %v172_v8  ;;  %v274_v15 = vmul.f32 2.0, %v187_v9 }
 0x13f   :  { %v277_v19 = vsub.f32 %v265_v12, %v271_v14  ;;  %v280_v22 = vsub.f32 %v268_v13, %v274_v15 }
 0x140   :  { %v177_v17 = vpop.f32.mrb[2].mxu0  ;;  %v192_v18 = vpop.f32.mrb[2].mxu1 }
 0x141   :  { %v179_v20 = vpop.f32.mrb[3].mxu0  ;;  %v194_v21 = vpop.f32.mrb[3].mxu1  ;;  %v283_v24 = vmax.f32 %v277_v19, 1e-12  ;;  %v286_v25 = vmax.f32 %v280_v22, 1e-12 }
 0x142   :  { %v272_v26 = vmul.f32 2.0, %v177_v17  ;;  %v275_v28 = vmul.f32 2.0, %v192_v18 }
 0x143   :  { %v289_v32 = vmin.f32 %v283_v24, 1e+12  ;;  %v292_v33 = vmin.f32 %v286_v25, 1e+12 }
 0x144   :  { %v182_v29 = vpop.f32.mrb[4].mxu0  ;;  %v197_v30 = vpop.f32.mrb[4].mxu1  ;;  %v278_v34 = vsub.f32 %v266_v23, %v272_v26  ;;  %v281_v37 = vsub.f32 %v269_v31, %v275_v28 }
 0x145   :  { %v184_v35 = vpop.f32.mrb[5].mxu0  ;;  %v199_v36 = vpop.f32.mrb[5].mxu1  ;;  %421 = vrsqrt.f32 %v289_v32  ;;  %v273_v41 = vmul.f32 2.0, %v182_v29  ;;  %v276_v42 = vmul.f32 2.0, %v197_v30  ;;  %vm297_vm0 = vcmp.eq.f32.partialorder %v289_v32, inf }
 0x146   :  { %423 = vrsqrt.f32 %v292_v33  ;;  %v284_v40 = vmax.f32 %v278_v34, 1e-12  ;;  %v287_v43 = vmax.f32 %v281_v37, 1e-12  ;;  %v300_v55 = vand.u32 2147483648, %v289_v32 }
 0x147   :  { %v279_v45 = vsub.f32 %v267_v38, %v273_v41  ;;  %v282_v46 = vsub.f32 %v270_v39, %v276_v42  ;;  %vm299_vm1 = vcmp.eq.f32.partialorder %v289_v32, 0.0  ;;  %vm318_vm2 = vcmp.eq.f32.partialorder %v292_v33, inf }
 0x148   :  { %v290_v44 = vmin.f32 %v284_v40, 1e+12  ;;  %v293_v47 = vmin.f32 %v287_v43, 1e+12  ;;  %v321_v58 = vand.u32 2147483648, %v292_v33  ;;  %vm320_vm3 = vcmp.eq.f32.partialorder %v292_v33, 0.0 }
 0x149   :  { %v285_v48 = vmax.f32 %v279_v45, 1e-12  ;;  %v288_v49 = vmax.f32 %v282_v46, 1e-12 }
 0x14a   :  { %425 = vrsqrt.f32 %v290_v44  ;;  %vm304_vm4 = vcmp.eq.f32.partialorder %v290_v44, inf  ;;  %v307_v1 = vand.u32 2147483648, %v290_v44  ;;  %vm306_vm5 = vcmp.eq.f32.partialorder %v290_v44, 0.0 }
 0x14b   :  { %427 = vrsqrt.f32 %v293_v47  ;;  %v291_v50 = vmin.f32 %v285_v48, 1e+12  ;;  %v294_v51 = vmin.f32 %v288_v49, 1e+12  ;;  %vm325_vm6 = vcmp.eq.f32.partialorder %v293_v47, inf }
 0x14c   :  { %v328_v4 = vand.u32 2147483648, %v293_v47  ;;  %vm327_vm7 = vcmp.eq.f32.partialorder %v293_v47, 0.0 }
 0x14d   :  { %429 = vrsqrt.f32 %v291_v50  ;;  %vm311_vm8 = vcmp.eq.f32.partialorder %v291_v50, inf  ;;  %v314_v11 = vand.u32 2147483648, %v291_v50  ;;  %vm313_vm9 = vcmp.eq.f32.partialorder %v291_v50, 0.0 }
 0x14e   :  { %431 = vrsqrt.f32 %v294_v51  ;;  %vm332_vm10 = vcmp.eq.f32.partialorder %v294_v51, inf  ;;  %v335_v14 = vand.u32 2147483648, %v294_v51  ;;  %vm334_vm11 = vcmp.eq.f32.partialorder %v294_v51, 0.0 }
 0x14f   :  { %v422_v52 = vpop.eup %421 }
 0x150   :  { %v424_v53 = vpop.eup %423  ;;  %v296_v54 = vmul.f32 %v422_v52, %v289_v32 }
 0x151   :  { %v317_v56 = vmul.f32 %v424_v53, %v292_v33 }
 0x152   :  { %v298_v57 = vsel %vm297_vm0, %v289_v32, %v296_v54 }
 0x153   :  { %v301_v59 = vsel %vm299_vm1, %v300_v55, %v298_v57  ;;  %v319_v60 = vsel %vm318_vm2, %v292_v33, %v317_v56 }
 0x154   :  { %337 = vst [vmem:[#allocation7] sm:$0xff] %v301_v59  ;;  %v322_v61 = vsel %vm320_vm3, %v321_v58, %v319_v60  ;;  %v426_v62 = vpop.eup %425 }
 0x155   :  { %340 = vst [vmem:[#allocation7 + $0x18] sm:$0xff] %v322_v61  ;;  %v428_v63 = vpop.eup %427  ;;  %v303_v0 = vmul.f32 %v426_v62, %v290_v44 }
 0x156   :  { %v324_v2 = vmul.f32 %v428_v63, %v293_v47 }
 0x157   :  { %v305_v3 = vsel %vm304_vm4, %v290_v44, %v303_v0  ;;  %v430_v7 = vpop.eup %429 }
 0x158   :  { %v308_v5 = vsel %vm306_vm5, %v307_v1, %v305_v3  ;;  %v326_v6 = vsel %vm325_vm6, %v293_v47, %v324_v2  ;;  %v432_v9 = vpop.eup %431  ;;  %v310_v10 = vmul.f32 %v430_v7, %v291_v50 }
 0x159   :  { %338 = vst [vmem:[#allocation7 + $0x8] sm:$0xff] %v308_v5  ;;  %v329_v8 = vsel %vm327_vm7, %v328_v4, %v326_v6  ;;  %v331_v12 = vmul.f32 %v432_v9, %v294_v51 }
 0x15a   :  { %341 = vst [vmem:[#allocation7 + $0x20] sm:$0xff] %v329_v8  ;;  %v312_v13 = vsel %vm311_vm8, %v291_v50, %v310_v10 }
 0x15b   :  { %v315_v15 = vsel %vm313_vm9, %v314_v11, %v312_v13  ;;  %v333_v16 = vsel %vm332_vm10, %v294_v51, %v331_v12 }
 0x15c   :  { %339 = vst [vmem:[#allocation7 + $0x10] sm:$0xff] %v315_v15  ;;  %v336_v17 = vsel %vm334_vm11, %v335_v14, %v333_v16 }
 0x15d   :  { %342 = vst [vmem:[#allocation7 + $0x28] sm:$0xff] %v336_v17 }
 0x15e   :  { %488 = shalt.err (!%p485_p6)
}
 0x15f   :  { %s489_s30 = scalar_lea.hbm %s599_s4, 768 }
 0x160   :  { %p490_p7 = scmp.ne.s32.totalorder %s599_s4, %s489_s30  ;;  %p493_p8 = scmp.lt.u32.totalorder %s489_s30, %s599_s4 }
 0x162   :  { %p495_p9 = pnand %p493_p8, %p490_p7 }
 0x164   :  { %498 = shalt.err (!%p495_p9)
}
 0x165   :  { %s511_s9 = smov 128   ;;  %s512_s10 = smov 8  }
 0x166   :  { %354 = dma.vmem_to_hbm [thread:$0]  %s349_s26, 768, %s599_s4, [#allocation4], %s511_s9, %s511_s9, %s512_s10  }
 0x167   :  { %503 = dma.done.wait [#allocation4], 768  }
 0x168   :  { %504 = vsyncadd [#allocation4], 4294966528 }
 0x169   :  { %358 = vsyncpa [#allocation3], 1 }
 0x16a   :  { %359 = vsyncpa [#allocation6], 1 }
 0x16b   :  { %360 = vsyncpa [#allocation4], 1 }

</bundles_post_ra>
